<compile_context>
chip_gen: v7x
topology: tpu7x:2x2x1
jax: 0.10.0
libtpu: 0.0.40
codegen_flags: <defaults>
</compile_context>

<pallas_src>
import functools

import jax
import jax.numpy as jnp
import numpy as np
from jax import lax
from jax.experimental import pallas as pl
from jax.experimental.pallas import tpu as pltpu

LANE = 128
SUBLANE = 8


def _sublane_multiple(dtype):
    """Sublane tiling requirement for a dtype (f32:8, bf16:16, int8:32)."""
    return {4: 8, 2: 16, 1: 32}.get(jnp.dtype(dtype).itemsize, 8)


def _accumulate(p_ref, t_ref, sum_ref, cnt_ref, *, nrows, chunk, ignore):
    """Accumulate masked BCE partial sums over the first `nrows` rows.

    Processes the block in `chunk`-row slices so intermediates stay a few
    dozen vregs; carries (8,128) f32/int32 accumulators in registers and
    adds into the resident output blocks once at the end.
    """
    chunk = min(chunk, nrows)
    n_full = nrows // chunk
    rem = nrows - n_full * chunk          # static, multiple of 8

    def chunk_sums(r0, cr):
        x = p_ref[pl.ds(r0, cr), :].astype(jnp.float32)
        t = t_ref[pl.ds(r0, cr), :].astype(jnp.float32)
        valid = (t >= 0.0) & (t != jnp.float32(ignore))
        # Numerically-stable BCE with logits: max(x,0) - x*t + log1p(exp(-|x|)).
        loss = jnp.maximum(x, 0.0) - x * t + jnp.log1p(jnp.exp(-jnp.abs(x)))
        loss = jnp.where(valid, loss, 0.0)
        # Reduce cr rows -> 8 sublanes with plain vector adds (VPU only).
        s = loss.reshape(-1, SUBLANE, LANE).sum(axis=0)
        k = valid.astype(jnp.int32).reshape(-1, SUBLANE, LANE).sum(axis=0)
        return s, k

    s_tot = jnp.zeros((SUBLANE, LANE), jnp.float32)
    n_tot = jnp.zeros((SUBLANE, LANE), jnp.int32)

    if n_full == 1:
        s, k = chunk_sums(0, chunk)
        s_tot, n_tot = s_tot + s, n_tot + k
    elif n_full > 1:
        def body(c, carry):
            s_acc, n_acc = carry
            r0 = pl.multiple_of(c * chunk, chunk)
            s, k = chunk_sums(r0, chunk)
            return s_acc + s, n_acc + k
        s_tot, n_tot = lax.fori_loop(0, n_full, body, (s_tot, n_tot),
                                     unroll=True)
    if rem > 0:
        s, k = chunk_sums(n_full * chunk, rem)
        s_tot, n_tot = s_tot + s, n_tot + k

    sum_ref[...] += s_tot
    cnt_ref[...] += n_tot


def _bce_masked_sum_kernel(p_ref, t_ref, sum_ref, cnt_ref, *,
                           num_blocks, blocks_per_core, block_rows,
                           tail_rows, chunk, ignore, has_phantom):
    """Masked BCE-with-logits partial reduction for one (block_rows, 128) tile.

    sum_ref : (8, 128) f32  per-core loss-sum accumulator (resident output).
    cnt_ref : (8, 128) i32  per-core valid-count accumulator (resident output).
    """
    g = pl.program_id(0)
    i = pl.program_id(1)

    @pl.when(i == 0)
    def _init():
        sum_ref[...] = jnp.zeros_like(sum_ref)
        cnt_ref[...] = jnp.zeros_like(cnt_ref)

    blk = g * blocks_per_core + i
    accum = functools.partial(_accumulate, p_ref, t_ref, sum_ref, cnt_ref,
                              chunk=chunk, ignore=ignore)

    if tail_rows != block_rows:
        # Fast path: full blocks, no index math beyond the target-based mask.
        @pl.when(blk < num_blocks - 1)
        def _fast():
            accum(nrows=block_rows)

        # Boundary path: the last real block has a statically-known number of
        # real rows; accumulate just those (phantom blocks fall through both).
        @pl.when(blk == num_blocks - 1)
        def _tail():
            accum(nrows=tail_rows)
    elif has_phantom:
        @pl.when(blk < num_blocks)
        def _fast():
            accum(nrows=block_rows)
    else:
        accum(nrows=block_rows)


def bce_with_logits_loss_2d(predict, target, *, ignore_label=255,
                            reduction="mean", max_block_rows=8192,
                            chunk_rows=512, num_cores=1,
                            vmem_limit_bytes=None):
    """Pallas equivalent of BCEWithLogitsLoss2d.forward (weight=None)."""
    # TODO(synk): per-class `weight` rescaling is not implemented (module default is None).
    # TODO(synk): reduction='none' has a data-dependent output shape (masked gather)
    #             and is not expressible as a fixed-shape Pallas output.
    assert predict.ndim == 4 and target.ndim == 4
    assert predict.shape == target.shape
    assert chunk_rows % SUBLANE == 0

    n, c, h, w = predict.shape
    total = n * c * h * w
    assert total > 0

    # Keep native dtypes (bf16 logits / integer-ish labels); the f32 convert
    # happens on the VPU inside the kernel -> no extra HBM upcast pass.
    p_flat = predict.reshape(-1)
    t_flat = target.reshape(-1)

    sub = max(_sublane_multiple(p_flat.dtype), _sublane_multiple(t_flat.dtype),
              SUBLANE)
    pack = sub * LANE
    padded_total = -(-total // pack) * pack
    if padded_total != total:
        pad = padded_total - total
        # Pad target with ignore_label so the pad tail masks itself out of both
        # the loss sum and the valid count; predict pad value is irrelevant.
        p_flat = jnp.pad(p_flat, (0, pad))
        t_flat = jnp.pad(t_flat, (0, pad), constant_values=ignore_label)

    rows = padded_total // LANE              # multiple of `sub`
    p2 = p_flat.reshape(rows, LANE)          # free reshape of contiguous data
    t2 = t_flat.reshape(rows, LANE)

    max_block_rows = max(sub, (max_block_rows // sub) * sub)
    block_rows = min(max_block_rows, rows)
    num_blocks = pl.cdiv(rows, block_rows)
    tail_rows = rows - (num_blocks - 1) * block_rows   # static, multiple of sub

    grid_g = max(1, min(num_cores, num_blocks))
    blocks_per_core = pl.cdiv(num_blocks, grid_g)
    has_phantom = grid_g * blocks_per_core > num_blocks

    def in_index(g, i):
        # Clamp phantom blocks onto the last real block; their compute is
        # skipped inside the kernel.
        return (jnp.minimum(g * blocks_per_core + i, num_blocks - 1), 0)

    if vmem_limit_bytes is None:
        in_bytes = block_rows * LANE * (p2.dtype.itemsize + t2.dtype.itemsize)
        # Double-buffered inputs + chunk intermediates + headroom; cap well
        # under v7x's 64 MiB physical VMEM (v5e/v6e have 128 MiB).
        vmem_limit_bytes = min(48 * 1024 * 1024, 2 * in_bytes + 8 * 1024 * 1024)

    kernel = functools.partial(
        _bce_masked_sum_kernel,
        num_blocks=num_blocks, blocks_per_core=blocks_per_core,
        block_rows=block_rows, tail_rows=tail_rows,
        chunk=min(chunk_rows, block_rows), ignore=float(ignore_label),
        has_phantom=has_phantom)

    sums, counts = pl.pallas_call(
        kernel,
        out_shape=(jax.ShapeDtypeStruct((grid_g, SUBLANE, LANE), jnp.float32),
                   jax.ShapeDtypeStruct((grid_g, SUBLANE, LANE), jnp.int32)),
        grid_spec=pltpu.PrefetchScalarGridSpec(
            num_scalar_prefetch=0,
            grid=(grid_g, blocks_per_core),
            in_specs=[
                pl.BlockSpec((block_rows, LANE), in_index),
                pl.BlockSpec((block_rows, LANE), in_index),
            ],
            out_specs=(
                pl.BlockSpec((None, SUBLANE, LANE), lambda g, i: (g, 0, 0)),
                pl.BlockSpec((None, SUBLANE, LANE), lambda g, i: (g, 0, 0)),
            ),
        ),
        compiler_params=pltpu.CompilerParams(
            # TODO(synk): on v7x, verify the leading axis engages both
            # TensorCores; if not, switch to pltpu.CORE_PARALLEL + num_cores=2.
            dimension_semantics=("parallel", "arbitrary"),
            vmem_limit_bytes=int(vmem_limit_bytes)),
    )(p2, t2)

    s = jnp.sum(sums)                        # one small cross-lane reduce in XLA
    k = jnp.sum(counts)                      # exact int32 valid-pixel count
    if reduction == "mean":
        # All-ignored input yields NaN (0/0), matching PyTorch's mean over an
        # empty selection.
        return s / k.astype(jnp.float32)
    elif reduction == "sum":
        return s
    else:
        raise NotImplementedError(
            "only 'mean'/'sum' reductions are implemented")


if __name__ == "__main__":
    key = jax.random.PRNGKey(0)

    def make_inputs(k, shape, dtype=jnp.float32):
        k1, k2, k3 = jax.random.split(k, 3)
        predict = jax.random.normal(k1, shape, jnp.float32).astype(dtype)
        target = jax.random.bernoulli(k2, 0.5, shape).astype(jnp.float32)
        ign = jax.random.bernoulli(k3, 0.2, shape)
        target = jnp.where(ign, jnp.float32(255.0), target)
        return predict, target

    def reference(predict, target, ignore_label=255):
        x = np.asarray(jnp.asarray(predict, jnp.float32)).reshape(-1)
        t = np.asarray(jnp.asarray(target, jnp.float32)).reshape(-1)
        m = (t >= 0) & (t != ignore_label)
        x, t = x[m], t[m]
        loss = np.maximum(x, 0.0) - x * t + np.log1p(np.exp(-np.abs(x)))
        return np.mean(loss)

    ks = jax.random.split(key, 4)

    # 1) Default config (single block), small NCHW input with ignore pixels;
    #    exercises the ignore-label pad tail (512 -> 1024 elements).
    p, t = make_inputs(ks[0], (2, 1, 16, 16))
    loss = jax.block_until_ready(bce_with_logits_loss_2d(p, t))
    ref = reference(p, t)
    assert np.allclose(np.asarray(loss), ref, rtol=1e-5, atol=1e-5), (loss, ref)

    # 2) Multi-block grid + static-size boundary block + multi-chunk inner loop.
    p, t = make_inputs(ks[1], (2, 1, 32, 48))        # 3072 elems -> 24 rows
    loss = jax.block_until_ready(
        bce_with_logits_loss_2d(p, t, max_block_rows=16, chunk_rows=8))
    ref = reference(p, t)
    assert np.allclose(np.asarray(loss), ref, rtol=1e-5, atol=1e-5), (loss, ref)

    # 3) Two-way leading "parallel" axis with an odd block count -> exercises
    #    the skipped phantom-block path.
    p, t = make_inputs(ks[2], (2, 1, 32, 48))        # 24 rows, 3 blocks of 8
    loss = jax.block_until_ready(
        bce_with_logits_loss_2d(p, t, max_block_rows=8, num_cores=2))
    ref = reference(p, t)
    assert np.allclose(np.asarray(loss), ref, rtol=1e-5, atol=1e-5), (loss, ref)

    # 4) Native bf16 logits: no wrapper upcast, convert on the VPU in-kernel.
    p, t = make_inputs(ks[3], (1, 1, 40, 40), dtype=jnp.bfloat16)  # 1600 elems
    loss = jax.block_until_ready(bce_with_logits_loss_2d(p, t))
    ref = reference(p, t)
    assert np.allclose(np.asarray(loss), ref, rtol=1e-5, atol=1e-5), (loss, ref)

    print("KERNEL_OK")
</pallas_src>

<mosaic_0001>
module attributes {stable_mosaic.version = 11 : i64} {
  func.func @_bce_masked_sum_kernel(%arg0: i32, %arg1: i32, %arg2: memref<8x128xf32, #tpu.memory_space<vmem>>, %arg3: memref<8x128xf32, #tpu.memory_space<vmem>>, %arg4: memref<1x8x128xf32, #tpu.memory_space<vmem>>, %arg5: memref<1x8x128xi32, #tpu.memory_space<vmem>>) attributes {dimension_semantics = [#tpu.dimension_semantics<parallel>, #tpu.dimension_semantics<arbitrary>], iteration_bounds = array<i64: 1, 1>, scalar_prefetch = 0 : i64, scratch_operands = 0 : i64, tpu.core_type = #tpu.core_type<tc>, window_params = [{transform_indices = @transform_0, window_bounds = array<i64: 8, 128>}, {transform_indices = @transform_1, window_bounds = array<i64: 8, 128>}, {transform_indices = @transform_2, window_bounds = array<i64: 1, 8, 128>}, {transform_indices = @transform_3, window_bounds = array<i64: 1, 8, 128>}]} {
    %c0_i32 = arith.constant 0 : i32
    %0 = arith.cmpi eq, %arg1, %c0_i32 : i32
    %1 = arith.extui %0 : i1 to i32
    %c0_i32_0 = arith.constant 0 : i32
    %2 = arith.cmpi ne, %1, %c0_i32_0 : i32
    scf.if %2 {
      %cst_24 = arith.constant 0.000000e+00 : f32
      %43 = vector.broadcast %cst_24 : f32 to vector<8x128xf32>
      %c0_25 = arith.constant 0 : index
      %c0_26 = arith.constant 0 : index
      %c0_27 = arith.constant 0 : index
      %44 = vector.load %arg4[%c0_25, %c0_26, %c0_27] : memref<1x8x128xf32, #tpu.memory_space<vmem>>, vector<1x8x128xf32>
      %45 = vector.shape_cast %44 : vector<1x8x128xf32> to vector<8x128xf32>
      %46 = vector.shape_cast %43 : vector<8x128xf32> to vector<1x8x128xf32>
      tpu.vector_store %arg4[%c0_25, %c0_26, %c0_27], %46 {strides = array<i32>} : memref<1x8x128xf32, #tpu.memory_space<vmem>>, vector<1x8x128xf32>,
      %c0_i32_28 = arith.constant 0 : i32
      %47 = vector.broadcast %c0_i32_28 : i32 to vector<8x128xi32>
      %c0_29 = arith.constant 0 : index
      %c0_30 = arith.constant 0 : index
      %c0_31 = arith.constant 0 : index
      %48 = vector.load %arg5[%c0_29, %c0_30, %c0_31] : memref<1x8x128xi32, #tpu.memory_space<vmem>>, vector<1x8x128xi32>
      %49 = vector.shape_cast %48 : vector<1x8x128xi32> to vector<8x128xi32>
      %50 = vector.shape_cast %47 : vector<8x128xi32> to vector<1x8x128xi32>
      tpu.vector_store %arg5[%c0_29, %c0_30, %c0_31], %50 {strides = array<i32>} : memref<1x8x128xi32, #tpu.memory_space<vmem>>, vector<1x8x128xi32>,
    } else {
    }
    %cst = arith.constant 0.000000e+00 : f32
    %3 = vector.broadcast %cst : f32 to vector<8x128xf32>
    %c0_i32_1 = arith.constant 0 : i32
    %4 = vector.broadcast %c0_i32_1 : i32 to vector<8x128xi32>
    %c0 = arith.constant 0 : index
    %c0_2 = arith.constant 0 : index
    %5 = vector.load %arg2[%c0, %c0_2] : memref<8x128xf32, #tpu.memory_space<vmem>>, vector<8x128xf32>
    %c0_3 = arith.constant 0 : index
    %c0_4 = arith.constant 0 : index
    %6 = vector.load %arg3[%c0_3, %c0_4] : memref<8x128xf32, #tpu.memory_space<vmem>>, vector<8x128xf32>
    %cst_5 = arith.constant 0.000000e+00 : f32
    %7 = vector.broadcast %cst_5 : f32 to vector<8x128xf32>
    %8 = arith.cmpf oge, %6, %7 : vector<8x128xf32>
    %cst_6 = arith.constant 2.550000e+02 : f32
    %9 = vector.broadcast %cst_6 : f32 to vector<8x128xf32>
    %10 = arith.cmpf one, %6, %9 : vector<8x128xf32>
    %11 = arith.andi %8, %10 : vector<8x128xi1>
    %cst_7 = arith.constant 0.000000e+00 : f32
    %12 = vector.broadcast %cst_7 : f32 to vector<8x128xf32>
    %13 = arith.maximumf %5, %12 : vector<8x128xf32>
    %14 = arith.mulf %5, %6 : vector<8x128xf32>
    %15 = arith.subf %13, %14 : vector<8x128xf32>
    %16 = math.absf %5 : vector<8x128xf32>
    %cst_8 = arith.constant 0.000000e+00 : f32
    %17 = vector.broadcast %cst_8 : f32 to vector<8x128xf32>
    %18 = arith.subf %17, %16 : vector<8x128xf32>
    %19 = math.exp %18 : vector<8x128xf32>
    %20 = math.log1p %19 : vector<8x128xf32>
    %21 = arith.addf %15, %20 : vector<8x128xf32>
    %cst_9 = arith.constant 0.000000e+00 : f32
    %22 = vector.broadcast %cst_9 : f32 to vector<8x128xf32>
    %23 = arith.select %11, %21, %22 : vector<8x128xi1>, vector<8x128xf32>
    %24 = vector.shape_cast %23 : vector<8x128xf32> to vector<1x8x128xf32>
    %cst_10 = arith.constant dense<0.000000e+00> : vector<8x128xf32>
    %25 = vector.multi_reduction <add>, %24, %cst_10 [0] : vector<1x8x128xf32> to vector<8x128xf32>
    %26 = arith.extui %11 : vector<8x128xi1> to vector<8x128xi32>
    %27 = vector.shape_cast %26 : vector<8x128xi32> to vector<1x8x128xi32>
    %cst_11 = arith.constant dense<0> : vector<8x128xi32>
    %28 = vector.multi_reduction <add>, %27, %cst_11 [0] : vector<1x8x128xi32> to vector<8x128xi32>
    %29 = arith.addf %3, %25 : vector<8x128xf32>
    %30 = arith.addi %4, %28 : vector<8x128xi32>
    %c0_12 = arith.constant 0 : index
    %c0_13 = arith.constant 0 : index
    %c0_14 = arith.constant 0 : index
    %31 = vector.load %arg4[%c0_12, %c0_13, %c0_14] : memref<1x8x128xf32, #tpu.memory_space<vmem>>, vector<1x8x128xf32>
    %32 = vector.shape_cast %31 : vector<1x8x128xf32> to vector<8x128xf32>
    %33 = arith.addf %32, %29 : vector<8x128xf32>
    %c0_15 = arith.constant 0 : index
    %c0_16 = arith.constant 0 : index
    %c0_17 = arith.constant 0 : index
    %34 = vector.load %arg4[%c0_15, %c0_16, %c0_17] : memref<1x8x128xf32, #tpu.memory_space<vmem>>, vector<1x8x128xf32>
    %35 = vector.shape_cast %34 : vector<1x8x128xf32> to vector<8x128xf32>
    %36 = vector.shape_cast %33 : vector<8x128xf32> to vector<1x8x128xf32>
    tpu.vector_store %arg4[%c0_15, %c0_16, %c0_17], %36 {strides = array<i32>} : memref<1x8x128xf32, #tpu.memory_space<vmem>>, vector<1x8x128xf32>,
    %c0_18 = arith.constant 0 : index
    %c0_19 = arith.constant 0 : index
    %c0_20 = arith.constant 0 : index
    %37 = vector.load %arg5[%c0_18, %c0_19, %c0_20] : memref<1x8x128xi32, #tpu.memory_space<vmem>>, vector<1x8x128xi32>
    %38 = vector.shape_cast %37 : vector<1x8x128xi32> to vector<8x128xi32>
    %39 = arith.addi %38, %30 : vector<8x128xi32>
    %c0_21 = arith.constant 0 : index
    %c0_22 = arith.constant 0 : index
    %c0_23 = arith.constant 0 : index
    %40 = vector.load %arg5[%c0_21, %c0_22, %c0_23] : memref<1x8x128xi32, #tpu.memory_space<vmem>>, vector<1x8x128xi32>
    %41 = vector.shape_cast %40 : vector<1x8x128xi32> to vector<8x128xi32>
    %42 = vector.shape_cast %39 : vector<8x128xi32> to vector<1x8x128xi32>
    tpu.vector_store %arg5[%c0_21, %c0_22, %c0_23], %42 {strides = array<i32>} : memref<1x8x128xi32, #tpu.memory_space<vmem>>, vector<1x8x128xi32>,
    return
  }
  func.func @transform_0(%arg0: i32, %arg1: i32) -> (i32, i32) {
    %c1_i32 = arith.constant 1 : i32
    %0 = arith.muli %arg0, %c1_i32 : i32
    %1 = arith.addi %0, %arg1 : i32
    %c0_i32 = arith.constant 0 : i32
    %2 = arith.minsi %1, %c0_i32 : i32
    %c0_i32_0 = arith.constant 0 : i32
    %c0_i32_1 = arith.constant 0 : i32
    return %2, %c0_i32_0 : i32, i32
  }
  func.func @transform_1(%arg0: i32, %arg1: i32) -> (i32, i32) {
    %c1_i32 = arith.constant 1 : i32
    %0 = arith.muli %arg0, %c1_i32 : i32
    %1 = arith.addi %0, %arg1 : i32
    %c0_i32 = arith.constant 0 : i32
    %2 = arith.minsi %1, %c0_i32 : i32
    %c0_i32_0 = arith.constant 0 : i32
    %c0_i32_1 = arith.constant 0 : i32
    return %2, %c0_i32_0 : i32, i32
  }
  func.func @transform_2(%arg0: i32, %arg1: i32) -> (i32, i32, i32) {
    %c0_i32 = arith.constant 0 : i32
    %c0_i32_0 = arith.constant 0 : i32
    %c0_i32_1 = arith.constant 0 : i32
    return %arg0, %c0_i32, %c0_i32_0 : i32, i32, i32
  }
  func.func @transform_3(%arg0: i32, %arg1: i32) -> (i32, i32, i32) {
    %c0_i32 = arith.constant 0 : i32
    %c0_i32_0 = arith.constant 0 : i32
    %c0_i32_1 = arith.constant 0 : i32
    return %arg0, %c0_i32, %c0_i32_0 : i32, i32, i32
  }
}

</mosaic_0001>

<bundles_post_ra>
// kernel: tpu_custom_call.1
= control target key start
LH: loop header
LB: loop body
LE: loop exit
PB: predicated region body
PF: predicated region fallthrough
CT: control target
= control target key end

     0   :  { %9 = vsyncpa [#allocation3], 0  ;;  %s314_s0 = inlined_call_operand.hbm [shape: f32[8,128], index: 0, kind: input, shape index: {}]   ;;  %s315_s1 = inlined_call_operand.hbm [shape: f32[8,128], index: 1, kind: input, shape index: {}]   ;;  %s316_s2 = inlined_call_operand.hbm [shape: f32[1,8,128], index: 2, kind: output, shape index: {0}]   ;;  %s317_s3 = inlined_call_operand.hbm [shape: s32[1,8,128], index: 3, kind: output, shape index: {1}]  }
   0x1   :  { %10 = vsyncpa [#allocation6], 0 }
   0x2   :  { %11 = vsyncpa [#allocation4], 0 }
   0x3   :  { %12 = vsyncpa [#allocation9], 0  ;;  %s233_s12 = smov [#allocation2]   ;;  %s234_s14 = smov [#allocation5]  }
   0x4   :  { %s24_s13 = sshll.u32 %s233_s12, 4  ;;  %s39_s15 = sshll.u32 %s234_s14, 4  ;;  %s25_s13 = int_to_ptr.vmem [resolvable:$true] %s24_s13  ;;  %s40_s15 = int_to_ptr.vmem [resolvable:$true] %s39_s15 }
   0x5   :  { %s137_s18 = scalar_lea.hbm %s314_s0, 128 }
   0x6   :  { %p138_p0 = scmp.ne.s32.totalorder %s314_s0, %s137_s18  ;;  %p141_p1 = scmp.lt.u32.totalorder %s137_s18, %s314_s0 }
   0x8   :  { %p143_p2 = pnand %p141_p1, %p138_p0 }
   0xa   :  { %146 = shalt.err (!%p143_p2)
}
   0xb   :  { %s147_s23 = scalar_lea.vmem %s25_s13, 128  ;;  %p152_p4 = scmp.lt.s32.totalorder %s25_s13, %s25_s13 }
   0xc   :  { %p148_p3 = scmp.ne.s32.totalorder %s25_s13, %s147_s23  ;;  %p153_p5 = scmp.lt.s32.totalorder %s147_s23, %s147_s23 }
   0xe   :  { %p154_p6 = por %p153_p5, %p152_p4 }
  0x10   :  { %p155_p7 = pnand %p154_p6, %p148_p3 }
  0x12   :  { %158 = shalt.err (!%p155_p7)
}
  0x13   :  { %27 = dma.hbm_to_vmem [thread:$0]  %s314_s0, 128, %s25_s13, [#allocation3]  }
  0x14   :  { %s159_s28 = scalar_lea.hbm %s315_s1, 128 }
  0x15   :  { %p160_p8 = scmp.ne.s32.totalorder %s315_s1, %s159_s28  ;;  %p163_p9 = scmp.lt.u32.totalorder %s159_s28, %s315_s1 }
  0x17   :  { %p165_p10 = pnand %p163_p9, %p160_p8 }
  0x19   :  { %168 = shalt.err (!%p165_p10)
}
  0x1a   :  { %s169_s6 = scalar_lea.vmem %s40_s15, 128  ;;  %p174_p12 = scmp.lt.s32.totalorder %s40_s15, %s40_s15 }
  0x1b   :  { %p170_p11 = scmp.ne.s32.totalorder %s40_s15, %s169_s6  ;;  %p175_p13 = scmp.lt.s32.totalorder %s169_s6, %s169_s6 }
  0x1d   :  { %p176_p0 = por %p175_p13, %p174_p12 }
  0x1f   :  { %p177_p1 = pnand %p176_p0, %p170_p11 }
  0x21   :  { %180 = shalt.err (!%p177_p1)
}
  0x22   :  { %42 = dma.hbm_to_vmem [thread:$0]  %s315_s1, 128, %s40_s15, [#allocation6]  }
  0x23   :  { %225 = dma.done.wait [#allocation3], 128  }
  0x24   :  { %226 = vsyncadd [#allocation3], 4294967168 }
  0x25   :  { %227 = dma.done.wait [#allocation6], 128  }
  0x26   :  { %228 = vsyncadd [#allocation6], 4294967168  ;;  %v61_v0 = vld [vmem:[#allocation2] sm:$0xff]  ;;  %v62_v1 = vld [vmem:[#allocation5] sm:$0xff]  ;;  %s235_s8 = smov [#allocation8]   ;;  %v236_v4 = vmov 0  }
  0x27   :  { %vm63_vm0 = vcmp.ge.f32.partialorder %v62_v1, 0.0  ;;  %vm64_vm1 = vcmp.ne.f32.partialorder %v62_v1, 255.0  ;;  %s109_s9 = sshll.u32 %s235_s8, 4  ;;  %v69_v3 = vand.u32 2147483647, %v61_v0  ;;  %s110_s9 = int_to_ptr.vmem [resolvable:$true] %s109_s9 }
  0x28   :  { %vm282_vm2 = vmand %vm63_vm0, %vm64_vm1  ;;  %s181_s1 = scalar_lea.vmem %s110_s9, 128  ;;  %p186_p3 = scmp.lt.s32.totalorder %s110_s9, %s110_s9 }
  0x29   :  { %v85_v5 = vsel %vm282_vm2, 1, %v236_v4  ;;  %v70_v6 = vsub.f32 0.0, %v69_v3  ;;  %p182_p2 = scmp.ne.s32.totalorder %s110_s9, %s181_s1  ;;  %p187_p4 = scmp.lt.s32.totalorder %s181_s1, %s181_s1 }
  0x2a   :  { %92 = vst [vmem:[#allocation8] sm:$0xff] %v85_v5 }
  0x2b   :  { %v71_v7 = vmul.f32 1.442695, %v70_v6  ;;  %p188_p5 = por %p187_p4, %p186_p3 }
  0x2d   :  { %p189_p6 = pnand %p188_p5, %p182_p2 }
  0x2f   :  { %192 = shalt.err (!%p189_p6)
}
  0x30   :  { %s193_s12 = scalar_lea.hbm %s317_s3, 128 }
  0x31   :  { %p194_p7 = scmp.ne.s32.totalorder %s317_s3, %s193_s12  ;;  %p197_p8 = scmp.lt.u32.totalorder %s193_s12, %s317_s3 }
  0x33   :  { %p199_p9 = pnand %p197_p8, %p194_p7 }
  0x35   :  { %202 = shalt.err (!%p199_p9)
}
  0x36   :  { %112 = dma.vmem_to_hbm [thread:$0]  %s110_s9, 128, %s317_s3, [#allocation9]   ;;  %133 = vpow2.f32 %v71_v7  ;;  %v66_v12 = vmax.f32 %v61_v0, 0.0  ;;  %v67_v13 = vmul.f32 %v62_v1, %v61_v0 }
  0x37   :  { %s237_s19 = smov [#allocation7]  }
  0x38   :  { %v68_v17 = vsub.f32 %v66_v12, %v67_v13  ;;  %s99_s20 = sshll.u32 %s237_s19, 4  ;;  %s100_s20 = int_to_ptr.vmem [resolvable:$true] %s99_s20 }
  0x39   :  { %s203_s3 = scalar_lea.vmem %s100_s20, 128  ;;  %p208_p11 = scmp.lt.s32.totalorder %s100_s20, %s100_s20 }
  0x3a   :  { %p204_p10 = scmp.ne.s32.totalorder %s100_s20, %s203_s3  ;;  %p209_p12 = scmp.lt.s32.totalorder %s203_s3, %s203_s3 }
  0x3c   :  { %p210_p13 = por %p209_p12, %p208_p11 }
  0x3e   :  { %p211_p0 = pnand %p210_p13, %p204_p10 }
  0x40   :  { %v134_v8 = vpop.eup %133 }
  0x41   :  { %v73_v9 = vadd.f32 1.0, %v134_v8  ;;  %v76_v10 = vmul.f32 -0.5, %v134_v8  ;;  %v79_v14 = vand.u32 2147483647, %v134_v8 }
  0x43   :  { %135 = vlog2.f32 %v73_v9  ;;  %v77_v11 = vadd.f32 1.0, %v76_v10  ;;  %vm80_vm3 = vcmp.lt.f32.partialorder %v79_v14, 0.0004427343 }
  0x45   :  { %v78_v15 = vmul.f32 %v134_v8, %v77_v11 }
  0x4d   :  { %v136_v16 = vpop.eup %135 }
  0x4e   :  { %v75_v18 = vmul.f32 0.6931472, %v136_v16 }
  0x50   :  { %v81_v19 = vsel %vm80_vm3, %v78_v15, %v75_v18 }
  0x51   :  { %v82_v20 = vadd.f32 %v81_v19, %v68_v17 }
  0x53   :  { %v83_v21 = vsel %vm282_vm2, %v82_v20, 0.0 }
  0x54   :  { %89 = vst [vmem:[#allocation7] sm:$0xff] %v83_v21 }
  0x55   :  { %214 = shalt.err (!%p211_p0)
}
  0x56   :  { %s215_s23 = scalar_lea.hbm %s316_s2, 128 }
  0x57   :  { %p216_p1 = scmp.ne.s32.totalorder %s316_s2, %s215_s23  ;;  %p219_p2 = scmp.lt.u32.totalorder %s215_s23, %s316_s2 }
  0x59   :  { %p221_p3 = pnand %p219_p2, %p216_p1 }
  0x5b   :  { %224 = shalt.err (!%p221_p3)
}
  0x5c   :  { %102 = dma.vmem_to_hbm [thread:$0]  %s100_s20, 128, %s316_s2, [#allocation4]  }
  0x5d   :  { %229 = dma.done.wait [#allocation4], 128  }
  0x5e   :  { %230 = vsyncadd [#allocation4], 4294967168 }
  0x5f   :  { %231 = dma.done.wait [#allocation9], 128  }
  0x60   :  { %232 = vsyncadd [#allocation9], 4294967168 }
  0x61   :  { %119 = vsyncpa [#allocation3], 1 }
  0x62   :  { %120 = vsyncpa [#allocation6], 1 }
  0x63   :  { %121 = vsyncpa [#allocation4], 1 }
  0x64   :  { %122 = vsyncpa [#allocation9], 1 }

</bundles_post_ra>
